<compile_context>
chip_gen: v6e
topology: v6e:2x2x1
jax: 0.10.0
libtpu: 0.0.40
codegen_flags: <defaults>
</compile_context>

<pallas_src>
import jax
import jax.numpy as jnp
from jax.experimental import pallas as pl
from jax.experimental.pallas import tpu as pltpu


def _lws_kernel(scale_ref, x_ref, o_ref):
    # scale_ref: (1, tc) block (same class-block every batch step -> stays
    # resident in VMEM). x_ref / o_ref: (tb, tc) blocks. Broadcast multiply on
    # the VPU; explicit astype so mixed dtypes (bf16 x, f32 scale) are safe.
    o_ref[...] = (scale_ref[...] * x_ref[...]).astype(o_ref.dtype)


def _sublane(dtype):
    # Sublane packing per dtype width: f32 -> 8, bf16 -> 16, int8/fp8 -> 32.
    return {4: 8, 2: 16, 1: 32}.get(jnp.dtype(dtype).itemsize, 8)


def _round_up(v, m):
    return ((v + m - 1) // m) * m


def _tpu_hw_info():
    """Best-effort (physical VMEM bytes per TensorCore, TensorCores per chip)."""
    vmem_bytes = 128 * 1024 * 1024   # v5e / v6e default
    n_tc = 1
    try:
        info = pltpu.get_tpu_info()
        vmem_bytes = int(getattr(info, "vmem_capacity_bytes", vmem_bytes))
    except Exception:
        pass
    try:
        kind = jax.devices()[0].device_kind.lower()
        if "v7" in kind:                      # v7x: 2 TCs, 64 MiB VMEM per TC
            n_tc = 2
            vmem_bytes = min(vmem_bytes, 64 * 1024 * 1024)
    except Exception:
        pass
    return vmem_bytes, n_tc


def learnable_weight_scaling(x, learned_norm, *, out_dtype=None,
                             vmem_tile_budget=None):
    """out = learned_norm * x, broadcast over batch.

    x:            (B, C)
    learned_norm: (1, C)
    """
    B, C = x.shape
    assert learned_norm.shape == (1, C)

    if out_dtype is None:
        out_dtype = jnp.result_type(x.dtype, learned_norm.dtype)
    out_dtype = jnp.dtype(out_dtype)

    vmem_bytes, n_tc = _tpu_hw_info()
    if vmem_bytes <= 64 * 1024 * 1024:        # v7x
        vmem_limit = 36 * 1024 * 1024
        default_budget = 14 * 1024 * 1024
    else:                                      # v5e / v6e
        vmem_limit = 48 * 1024 * 1024
        default_budget = 24 * 1024 * 1024
    if vmem_tile_budget is None:
        vmem_tile_budget = default_budget

    x_item = jnp.dtype(x.dtype).itemsize
    s_item = jnp.dtype(learned_norm.dtype).itemsize
    o_item = out_dtype.itemsize
    row_bytes = x_item + o_item               # per-element bytes of x + out tiles
    # Sublane unit: max packing over ALL participating dtypes (bf16 in / f32 out
    # must still land on 16-row boundaries for the bf16 input tiles).
    sub = max(_sublane(x.dtype), _sublane(learned_norm.dtype), _sublane(out_dtype))

    # ---- class (lane) tiling ------------------------------------------------
    # Only tile C when even a sub-row batch tile at full C would blow the VMEM
    # budget (footprint ~= 2 double-buffered tiles of x + out).
    C_pad = _round_up(C, 128)
    if 2 * sub * C_pad * row_bytes > vmem_tile_budget:
        tc = max(128, (vmem_tile_budget // (2 * sub * row_bytes)) // 128 * 128)
        tc = min(tc, C_pad)
        if tc >= C:
            tc = C                            # degenerate: one full-width block
    else:
        tc = C                                # full class dim (lane-dense, no pad)
    tc_pad = _round_up(tc, 128)
    n_c = pl.cdiv(C, tc)

    # ---- batch (sublane) tiling ----------------------------------------------
    max_tb = max(sub, (vmem_tile_budget // (2 * tc_pad * row_bytes)) // sub * sub)
    tb = B if B <= max_tb else max_tb          # full dim if it fits, else sub-mult
    n_b = pl.cdiv(B, tb)

    # Megacore split: only worth it on 2-TC chips (v7x) and for big problems
    # (>= ~8 MiB of HBM traffic); otherwise the extra grid step is pure overhead.
    if (n_tc >= 2 and n_b == 1 and n_c == 1 and B >= 2 * sub
            and B * C * row_bytes >= (8 << 20)):
        tb = _round_up(pl.cdiv(B, 2), sub)
        n_b = pl.cdiv(B, tb)

    out = pl.pallas_call(
        _lws_kernel,
        out_shape=jax.ShapeDtypeStruct((B, C), out_dtype),
        grid_spec=pltpu.PrefetchScalarGridSpec(
            num_scalar_prefetch=0,
            grid=(n_b, n_c),
            in_specs=[
                # scale: one (1, tc) block per class tile, reused across batch
                pl.BlockSpec((1, tc), lambda i, j: (0, j)),
                # x: tiled over batch and (optionally) class
                pl.BlockSpec((tb, tc), lambda i, j: (i, j)),
            ],
            out_specs=pl.BlockSpec((tb, tc), lambda i, j: (i, j)),
        ),
        compiler_params=pltpu.CompilerParams(
            dimension_semantics=("parallel", "parallel"),
            vmem_limit_bytes=vmem_limit,
        ),
        cost_estimate=pl.CostEstimate(
            flops=B * C,
            transcendentals=0,
            bytes_accessed=B * C * (x_item + o_item) + C * s_item,
        ),
    )(learned_norm, x)
    return out


# TODO(synk): if this op sits next to a classifier matmul / loss kernel, fuse the
# scale multiply into that kernel's epilogue instead of a standalone pallas_call.


if __name__ == "__main__":
    key = jax.random.PRNGKey(0)
    k = jax.random.split(key, 10)

    def check(out, ref, name, atol=1e-6, rtol=1e-6):
        out = jax.block_until_ready(out)
        assert out.shape == ref.shape, name
        assert out.dtype == ref.dtype, name
        assert jnp.allclose(out, ref, atol=atol, rtol=rtol), name

    # Case 1: small toy shape consistent with the module's forward (B, num_classes).
    B1, C1 = 8, 32
    x1 = jax.random.normal(k[0], (B1, C1), dtype=jnp.float32)
    w1 = jnp.ones((1, C1), jnp.float32) + 0.1 * jax.random.normal(k[1], (1, C1))
    check(learnable_weight_scaling(x1, w1), w1 * x1, "case1")

    # Case 2: ragged batch + non-multiple-of-128 classes (typical LWS: C=1000),
    # single full-extent block, no padding ops in the wrapper.
    B2, C2 = 10, 1000
    x2 = jax.random.normal(k[2], (B2, C2), dtype=jnp.float32)
    w2 = jnp.ones((1, C2), jnp.float32) + 0.1 * jax.random.normal(k[3], (1, C2))
    check(learnable_weight_scaling(x2, w2), w2 * x2, "case2")

    # Case 3: forced batch tiling with a ragged (masked) last block.
    B3, C3 = 50, 256
    x3 = jax.random.normal(k[4], (B3, C3), dtype=jnp.float32)
    w3 = jnp.ones((1, C3), jnp.float32) + 0.1 * jax.random.normal(k[5], (1, C3))
    check(learnable_weight_scaling(x3, w3, vmem_tile_budget=64 * 1024),
          w3 * x3, "case3")

    # Case 4: forced class tiling (2-D grid).
    B4, C4 = 16, 4096
    x4 = jax.random.normal(k[6], (B4, C4), dtype=jnp.float32)
    w4 = jnp.ones((1, C4), jnp.float32) + 0.1 * jax.random.normal(k[7], (1, C4))
    check(learnable_weight_scaling(x4, w4, vmem_tile_budget=128 * 1024),
          w4 * x4, "case4")

    # Case 5: mixed dtype (bf16 activations, f32 scale) -> f32 out.
    B5, C5 = 32, 384
    x5 = jax.random.normal(k[8], (B5, C5), dtype=jnp.float32).astype(jnp.bfloat16)
    w5 = jnp.ones((1, C5), jnp.float32) + 0.1 * jax.random.normal(k[9], (1, C5))
    check(learnable_weight_scaling(x5, w5), w5 * x5, "case5")

    print("KERNEL_OK")
</pallas_src>

<mosaic_0001>
module attributes {stable_mosaic.version = 11 : i64} {
  func.func @_lws_kernel(%arg0: i32, %arg1: i32, %arg2: memref<1x32xf32, #tpu.memory_space<vmem>>, %arg3: memref<8x32xf32, #tpu.memory_space<vmem>>, %arg4: memref<8x32xf32, #tpu.memory_space<vmem>>) attributes {dimension_semantics = [#tpu.dimension_semantics<parallel>, #tpu.dimension_semantics<parallel>], iteration_bounds = array<i64: 1, 1>, scalar_prefetch = 0 : i64, scratch_operands = 0 : i64, tpu.core_type = #tpu.core_type<tc>, window_params = [{transform_indices = @transform_0, window_bounds = array<i64: 1, 32>}, {transform_indices = @transform_1, window_bounds = array<i64: 8, 32>}, {transform_indices = @transform_2, window_bounds = array<i64: 8, 32>}]} {
    %c0 = arith.constant 0 : index
    %c0_0 = arith.constant 0 : index
    %0 = vector.load %arg2[%c0, %c0_0] : memref<1x32xf32, #tpu.memory_space<vmem>>, vector<1x32xf32>
    %c0_1 = arith.constant 0 : index
    %c0_2 = arith.constant 0 : index
    %1 = vector.load %arg3[%c0_1, %c0_2] : memref<8x32xf32, #tpu.memory_space<vmem>>, vector<8x32xf32>
    %2 = vector.broadcast %0 : vector<1x32xf32> to vector<8x32xf32>
    %3 = arith.mulf %2, %1 : vector<8x32xf32>
    %c0_3 = arith.constant 0 : index
    %c0_4 = arith.constant 0 : index
    %4 = vector.load %arg4[%c0_3, %c0_4] : memref<8x32xf32, #tpu.memory_space<vmem>>, vector<8x32xf32>
    tpu.vector_store %arg4[%c0_3, %c0_4], %3 {strides = array<i32>} : memref<8x32xf32, #tpu.memory_space<vmem>>, vector<8x32xf32>,
    return
  }
  func.func @transform_0(%arg0: i32, %arg1: i32) -> (i32, i32) {
    %c0_i32 = arith.constant 0 : i32
    %c0_i32_0 = arith.constant 0 : i32
    return %c0_i32, %arg1 : i32, i32
  }
  func.func @transform_1(%arg0: i32, %arg1: i32) -> (i32, i32) {
    %c0_i32 = arith.constant 0 : i32
    return %arg0, %arg1 : i32, i32
  }
  func.func @transform_2(%arg0: i32, %arg1: i32) -> (i32, i32) {
    %c0_i32 = arith.constant 0 : i32
    return %arg0, %arg1 : i32, i32
  }
}

</mosaic_0001>

<bundles_post_ra>
// kernel: tpu_custom_call.1
= control target key start
LH: loop header
LB: loop body
LE: loop exit
PB: predicated region body
PF: predicated region fallthrough
CT: control target
= control target key end

     0   :  { %7 = vsyncpa [#allocation3], 0  ;;  %s160_s0 = inlined_call_operand.hbm [shape: f32[1,32], index: 0, kind: input, shape index: {}]   ;;  %s161_s1 = inlined_call_operand.hbm [shape: f32[8,32], index: 1, kind: input, shape index: {}]   ;;  %s162_s2 = inlined_call_operand.hbm [shape: f32[8,32], index: 2, kind: output, shape index: {}]  }
   0x1   :  { %8 = vsyncpa [#allocation6], 0 }
   0x2   :  { %9 = vsyncpa [#allocation4], 0  ;;  %s133_s9 = smov [#allocation2]   ;;  %s134_s11 = smov [#allocation5]  }
   0x3   :  { %s16_s10 = sshll.u32 %s133_s9, 4  ;;  %s26_s12 = sshll.u32 %s134_s11, 4  ;;  %s17_s10 = int_to_ptr.vmem [resolvable:$true] %s16_s10  ;;  %s27_s12 = int_to_ptr.vmem [resolvable:$true] %s26_s12 }
   0x4   :  { %s75_s13 = scalar_lea.vmem %s17_s10, 16  ;;  %s79_s14 = scalar_lea.vmem %s17_s10, 32 }
   0x5   :  { %p76_p0 = scmp.ne.s32.totalorder %s17_s10, %s75_s13  ;;  %p80_p1 = scmp.lt.s32.totalorder %s17_s10, %s17_s10 }
   0x6   :  { %p81_p2 = scmp.lt.s32.totalorder %s79_s14, %s75_s13 }
   0x8   :  { %p82_p3 = por %p81_p2, %p80_p1 }
   0xa   :  { %p83_p4 = pnand %p82_p3, %p76_p0 }
   0xc   :  { %86 = shalt.err (!%p83_p4)
}
   0xd   :  { %19 = dma.hbm_to_vmem [thread:$0]  %s160_s0, 16, %s17_s10, [#allocation3]  }
   0xe   :  { %s95_s17 = scalar_lea.vmem %s27_s12, 128  ;;  %p100_p6 = scmp.lt.s32.totalorder %s27_s12, %s27_s12 }
   0xf   :  { %p96_p5 = scmp.ne.s32.totalorder %s27_s12, %s95_s17  ;;  %p101_p7 = scmp.lt.s32.totalorder %s95_s17, %s95_s17 }
  0x11   :  { %p102_p8 = por %p101_p7, %p100_p6 }
  0x13   :  { %p103_p9 = pnand %p102_p8, %p96_p5 }
  0x15   :  { %106 = shalt.err (!%p103_p9)
}
  0x16   :  { %29 = dma.hbm_to_vmem [thread:$0]  %s161_s1, 128, %s27_s12, [#allocation6]  }
  0x17   :  { %127 = dma.done.wait [#allocation3], 16  }
  0x18   :  { %128 = vsyncadd [#allocation3], 4294967280 }
  0x19   :  { %129 = dma.done.wait [#allocation6], 128  }
  0x1a   :  { %130 = vsyncadd [#allocation6], 4294967168  ;;  %s135_s20 = smov [#allocation7]   ;;  %v63_v0 = vld [vmem:[#allocation2] ss:$0 sm:$0xff]  ;;  %v37_v1 = vld [vmem:[#allocation5] sm:$0xff] }
  0x1b   :  { %s53_s21 = sshll.u32 %s135_s20, 4  ;;  %vm45_vm0 = vcmask 261120   ;;  %v44_v2 = vmul.f32 %v63_v0, %v37_v1  ;;  %s54_s21 = int_to_ptr.vmem [resolvable:$true] %s53_s21 }
  0x1c   :  { %s107_s0 = scalar_lea.vmem %s54_s21, 128  ;;  %p112_p11 = scmp.lt.s32.totalorder %s54_s21, %s54_s21 }
  0x1d   :  { %46 = vst.msk [vmem:[#allocation7] sm:$0xff] %vm45_vm0, %v44_v2  ;;  %p108_p10 = scmp.ne.s32.totalorder %s54_s21, %s107_s0  ;;  %p113_p12 = scmp.lt.s32.totalorder %s107_s0, %s107_s0 }
  0x1f   :  { %p114_p13 = por %p113_p12, %p112_p11 }
  0x21   :  { %p115_p0 = pnand %p114_p13, %p108_p10 }
  0x23   :  { %118 = shalt.err (!%p115_p0)
}
  0x24   :  { %56 = dma.vmem_to_hbm [thread:$0]  %s54_s21, 128, %s162_s2, [#allocation4]  }
  0x25   :  { %131 = dma.done.wait [#allocation4], 128  }
  0x26   :  { %132 = vsyncadd [#allocation4], 4294967168 }
  0x27   :  { %60 = vsyncpa [#allocation3], 1 }
  0x28   :  { %61 = vsyncpa [#allocation6], 1 }
  0x29   :  { %62 = vsyncpa [#allocation4], 1 }

</bundles_post_ra>
